<compile_context>
chip_gen: v7x
topology: tpu7x:2x2x1
jax: 0.10.0
libtpu: 0.0.40
codegen_flags: <defaults>
</compile_context>

<pallas_src>
import functools
import numpy as np

import jax
import jax.numpy as jnp
from jax.experimental import pallas as pl
from jax.experimental.pallas import tpu as pltpu


def _round_up(a, b):
    return ((a + b - 1) // b) * b


# ---------------------------------------------------------------------------
# Pallas kernel: full MLP hot path (matmuls + fused layernorm + relu).
# ---------------------------------------------------------------------------
def _class_branch_kernel(num_fcs, mid_channels, eps, *refs):
    # refs = (x_ref, [w_i, bgb_i] * num_fcs, w_final, b_final, o_ref)
    x_ref = refs[0]
    o_ref = refs[-1]
    p = refs[1:-1]

    inv_mid = 1.0 / float(mid_channels)

    # bf16 operands for the MXU, f32 accumulation.
    h = x_ref[...].astype(jnp.bfloat16)

    idx = 0
    for _ in range(num_fcs):
        w = p[idx][...]            # (d_in_p, mid_p) bf16
        bgb = p[idx + 1][...]      # (3, mid_p) f32 -> rows: bias, gamma, beta
        idx += 2
        b = bgb[0:1, :]
        g = bgb[1:2, :]
        be = bgb[2:3, :]

        # Linear (bf16 x bf16 -> f32 accumulate), bias add in f32.
        h = jnp.dot(h, w, preferred_element_type=jnp.float32) + b

        # LayerNorm over the real `mid_channels` features.  Padded columns of h
        # are exactly zero (zero-padded weight cols / bias), so single-pass
        # sums over the padded width equal sums over the real width.
        s1 = jnp.sum(h, axis=-1, keepdims=True)
        s2 = jnp.sum(h * h, axis=-1, keepdims=True)
        mean = s1 * inv_mid
        var = s2 * inv_mid - mean * mean
        rstd = jax.lax.rsqrt(var + eps)
        # gamma/beta are zero-padded, so padded lanes come out as exactly 0.
        h = (h - mean) * rstd * g + be

        # ReLU, then back to bf16 for the next matmul.
        h = jnp.maximum(h, 0.0).astype(jnp.bfloat16)

    w_f = p[idx][...]              # (mid_p, out_p) bf16
    b_f = p[idx + 1][...]          # (1, out_p) f32
    out = jnp.dot(h, w_f, preferred_element_type=jnp.float32) + b_f
    o_ref[...] = out.astype(o_ref.dtype)


# ---------------------------------------------------------------------------
# Wrapper: flatten leading dims, pad rows/features, tile rows over the grid.
# ---------------------------------------------------------------------------
def class_branch_forward(x, params, *, tile_m=256, eps=1e-5, lane=128):
    num_fcs = len(params["ws"])
    lead_shape = x.shape[:-1]
    in_ch = x.shape[-1]
    mid = params["ws"][0].shape[1]
    out_ch = params["w_final"].shape[1]

    in_p = _round_up(in_ch, lane)
    mid_p = _round_up(mid, lane)
    out_p = _round_up(out_ch, lane)

    n_rows = int(np.prod(lead_shape)) if lead_shape else 1
    tm = min(_round_up(tile_m, 8), _round_up(n_rows, 8))
    rows_p = _round_up(n_rows, tm)

    # Activations: pad rows to a multiple of the tile and features to 128.
    x2 = x.reshape(n_rows, in_ch)
    x2 = jnp.pad(x2, ((0, rows_p - n_rows), (0, in_p - in_ch)))

    flat_params = []
    in_specs = [pl.BlockSpec((tm, in_p), lambda i: (i, 0))]

    d_in_p = in_p
    for k in range(num_fcs):
        w = params["ws"][k]
        d_in = w.shape[0]
        w_pad = jnp.pad(w, ((0, d_in_p - d_in), (0, mid_p - mid))).astype(jnp.bfloat16)
        bgb = jnp.stack([
            jnp.pad(params["bs"][k], (0, mid_p - mid)),
            jnp.pad(params["gammas"][k], (0, mid_p - mid)),
            jnp.pad(params["betas"][k], (0, mid_p - mid)),
        ]).astype(jnp.float32)                               # (3, mid_p)
        flat_params += [w_pad, bgb]
        in_specs += [
            pl.BlockSpec((d_in_p, mid_p), lambda i: (0, 0)),
            pl.BlockSpec((3, mid_p), lambda i: (0, 0)),
        ]
        d_in_p = mid_p

    w_f = jnp.pad(params["w_final"],
                  ((0, mid_p - mid), (0, out_p - out_ch))).astype(jnp.bfloat16)
    b_f = jnp.pad(params["b_final"], (0, out_p - out_ch)).reshape(1, out_p)
    b_f = b_f.astype(jnp.float32)
    flat_params += [w_f, b_f]
    in_specs += [
        pl.BlockSpec((mid_p, out_p), lambda i: (0, 0)),
        pl.BlockSpec((1, out_p), lambda i: (0, 0)),
    ]

    # VMEM budget: 2x buffers for every input/output block (Pallas
    # double-buffers all of them), with headroom, capped for v7x (64 MiB).
    itemsize = jnp.dtype(x.dtype).itemsize
    vmem_need = 2 * tm * in_p * itemsize + 2 * tm * out_p * itemsize
    for a in flat_params:
        vmem_need += 2 * a.size * jnp.dtype(a.dtype).itemsize
    vmem_limit = int(min(max(2 * vmem_need, 32 * 1024 * 1024), 64 * 1024 * 1024))

    kernel = functools.partial(_class_branch_kernel, num_fcs, mid, eps)

    out = pl.pallas_call(
        kernel,
        out_shape=jax.ShapeDtypeStruct((rows_p, out_p), x.dtype),
        grid_spec=pltpu.PrefetchScalarGridSpec(
            num_scalar_prefetch=0,
            grid=(rows_p // tm,),
            in_specs=in_specs,
            out_specs=pl.BlockSpec((tm, out_p), lambda i: (i, 0)),
        ),
        compiler_params=pltpu.CompilerParams(
            dimension_semantics=("parallel",),
            vmem_limit_bytes=vmem_limit,
        ),
    )(x2, *flat_params)

    out = out[:n_rows, :out_ch]
    return out.reshape(*lead_shape, out_ch)


# ---------------------------------------------------------------------------
# Deterministic parameter init (mirrors the PyTorch module's __init__).
# ---------------------------------------------------------------------------
def init_class_branch_params(key, num_fcs, in_channels, mid_channels, out_channels):
    params = {"ws": [], "bs": [], "gammas": [], "betas": []}
    d_in = in_channels
    for _ in range(num_fcs):
        key, kw, kb = jax.random.split(key, 3)
        bound = 1.0 / np.sqrt(d_in)   # PyTorch nn.Linear default init
        params["ws"].append(
            jax.random.uniform(kw, (d_in, mid_channels), jnp.float32, -bound, bound))
        params["bs"].append(
            jax.random.uniform(kb, (mid_channels,), jnp.float32, -bound, bound))
        params["gammas"].append(jnp.ones((mid_channels,), jnp.float32))
        params["betas"].append(jnp.zeros((mid_channels,), jnp.float32))
        d_in = mid_channels
    # Final linear: xavier_uniform_ weight, zero bias (as in _init_weights).
    key, kw = jax.random.split(key)
    limit = np.sqrt(6.0 / (mid_channels + out_channels))
    params["w_final"] = jax.random.uniform(
        kw, (mid_channels, out_channels), jnp.float32, -limit, limit)
    params["b_final"] = jnp.zeros((out_channels,), jnp.float32)
    return params


# ---------------------------------------------------------------------------
# References.
# ---------------------------------------------------------------------------
def class_branch_ref(x, params, eps=1e-5):
    """Pure f32 reference (HIGHEST-precision matmuls)."""
    h = x.astype(jnp.float32)
    for w, b, g, be in zip(params["ws"], params["bs"],
                           params["gammas"], params["betas"]):
        h = jnp.dot(h, w, precision=jax.lax.Precision.HIGHEST) + b
        mean = jnp.mean(h, axis=-1, keepdims=True)
        var = jnp.mean((h - mean) ** 2, axis=-1, keepdims=True)
        h = (h - mean) * jax.lax.rsqrt(var + eps) * g + be
        h = jnp.maximum(h, 0.0)
    out = jnp.dot(h, params["w_final"],
                  precision=jax.lax.Precision.HIGHEST) + params["b_final"]
    return out.astype(x.dtype)


def class_branch_ref_mixed(x, params, eps=1e-5):
    """Mixed-precision reference mirroring the kernel (bf16 matmul operands,
    f32 accumulation, f32 LayerNorm)."""
    h = x.astype(jnp.bfloat16)
    for w, b, g, be in zip(params["ws"], params["bs"],
                           params["gammas"], params["betas"]):
        h = jnp.dot(h, w.astype(jnp.bfloat16),
                    preferred_element_type=jnp.float32) + b
        mean = jnp.mean(h, axis=-1, keepdims=True)
        var = jnp.mean((h - mean) ** 2, axis=-1, keepdims=True)
        h = (h - mean) * jax.lax.rsqrt(var + eps) * g + be
        h = jnp.maximum(h, 0.0).astype(jnp.bfloat16)
    out = jnp.dot(h, params["w_final"].astype(jnp.bfloat16),
                  preferred_element_type=jnp.float32) + params["b_final"]
    return out.astype(x.dtype)


if __name__ == "__main__":
    num_fcs = 2
    in_channels, mid_channels, out_channels = 32, 32, 16

    key = jax.random.PRNGKey(0)
    key, kx = jax.random.split(key)
    params = init_class_branch_params(
        key, num_fcs, in_channels, mid_channels, out_channels)

    # Small case (batch=2, seq=8).
    x = jax.random.normal(kx, (2, 8, in_channels), jnp.float32)
    out = jax.block_until_ready(class_branch_forward(x, params))
    assert out.shape == (2, 8, out_channels)
    np.testing.assert_allclose(np.asarray(out),
                               np.asarray(class_branch_ref_mixed(x, params)),
                               rtol=2e-3, atol=2e-3)
    # bf16 matmul operands -> compare to the true-f32 reference loosely.
    np.testing.assert_allclose(np.asarray(out),
                               np.asarray(class_branch_ref(x, params)),
                               rtol=5e-2, atol=5e-2)

    # Larger case: exercises multi-step grid, row padding (600 rows -> 3 tiles).
    key, kx2 = jax.random.split(key)
    x_big = jax.random.normal(kx2, (2, 300, in_channels), jnp.float32)
    out_big = jax.block_until_ready(class_branch_forward(x_big, params, tile_m=256))
    assert out_big.shape == (2, 300, out_channels)
    np.testing.assert_allclose(np.asarray(out_big),
                               np.asarray(class_branch_ref_mixed(x_big, params)),
                               rtol=2e-3, atol=2e-3)

    print("KERNEL_OK")
</pallas_src>

<mosaic_0001>
module attributes {stable_mosaic.version = 11 : i64} {
  func.func @_class_branch_kernel(%arg0: i32, %arg1: memref<16x128xf32, #tpu.memory_space<vmem>>, %arg2: memref<128x128xbf16, #tpu.memory_space<vmem>>, %arg3: memref<3x128xf32, #tpu.memory_space<vmem>>, %arg4: memref<128x128xbf16, #tpu.memory_space<vmem>>, %arg5: memref<3x128xf32, #tpu.memory_space<vmem>>, %arg6: memref<128x128xbf16, #tpu.memory_space<vmem>>, %arg7: memref<1x128xf32, #tpu.memory_space<vmem>>, %arg8: memref<16x128xf32, #tpu.memory_space<vmem>>) attributes {dimension_semantics = [#tpu.dimension_semantics<parallel>], iteration_bounds = array<i64: 1>, scalar_prefetch = 0 : i64, scratch_operands = 0 : i64, tpu.core_type = #tpu.core_type<tc>, window_params = [{transform_indices = @transform_0, window_bounds = array<i64: 16, 128>}, {pipeline_mode = #tpu.pipeline_mode<synchronous>, transform_indices = @transform_1, window_bounds = array<i64: 128, 128>}, {pipeline_mode = #tpu.pipeline_mode<synchronous>, transform_indices = @transform_2, window_bounds = array<i64: 3, 128>}, {pipeline_mode = #tpu.pipeline_mode<synchronous>, transform_indices = @transform_3, window_bounds = array<i64: 128, 128>}, {pipeline_mode = #tpu.pipeline_mode<synchronous>, transform_indices = @transform_4, window_bounds = array<i64: 3, 128>}, {pipeline_mode = #tpu.pipeline_mode<synchronous>, transform_indices = @transform_5, window_bounds = array<i64: 128, 128>}, {pipeline_mode = #tpu.pipeline_mode<synchronous>, transform_indices = @transform_6, window_bounds = array<i64: 1, 128>}, {transform_indices = @transform_7, window_bounds = array<i64: 16, 128>}]} {
    %c0 = arith.constant 0 : index
    %c0_0 = arith.constant 0 : index
    %0 = vector.load %arg1[%c0, %c0_0] : memref<16x128xf32, #tpu.memory_space<vmem>>, vector<16x128xf32>
    %1 = arith.truncf %0 : vector<16x128xf32> to vector<16x128xbf16>
    %c0_1 = arith.constant 0 : index
    %c0_2 = arith.constant 0 : index
    %2 = vector.load %arg2[%c0_1, %c0_2] : memref<128x128xbf16, #tpu.memory_space<vmem>>, vector<128x128xbf16>
    %c0_3 = arith.constant 0 : index
    %c0_4 = arith.constant 0 : index
    %3 = vector.load %arg3[%c0_3, %c0_4] : memref<3x128xf32, #tpu.memory_space<vmem>>, vector<3x128xf32>
    %4 = vector.extract_strided_slice %3 {offsets = [0, 0], sizes = [1, 128], strides = [1, 1]} : vector<3x128xf32> to vector<1x128xf32>
    %5 = vector.extract_strided_slice %3 {offsets = [1, 0], sizes = [1, 128], strides = [1, 1]} : vector<3x128xf32> to vector<1x128xf32>
    %6 = vector.extract_strided_slice %3 {offsets = [2, 0], sizes = [1, 128], strides = [1, 1]} : vector<3x128xf32> to vector<1x128xf32>
    %cst = arith.constant dense<0.000000e+00> : vector<16x128xf32>
    %7 = tpu.matmul %1, %2, %cst {dimension_numbers = #tpu.dot_dimension_numbers<[1], [0], [0], [1], [0, 0, 1, 1], [], []>} : vector<16x128xbf16>, vector<128x128xbf16>, vector<16x128xf32> -> vector<16x128xf32>
    %8 = vector.broadcast %4 : vector<1x128xf32> to vector<16x128xf32>
    %9 = arith.addf %7, %8 : vector<16x128xf32>
    %cst_5 = arith.constant dense<0.000000e+00> : vector<16xf32>
    %10 = vector.multi_reduction <add>, %9, %cst_5 [1] : vector<16x128xf32> to vector<16xf32>
    %11 = vector.shape_cast %10 : vector<16xf32> to vector<16x1xf32>
    %12 = arith.mulf %9, %9 : vector<16x128xf32>
    %cst_6 = arith.constant dense<0.000000e+00> : vector<16xf32>
    %13 = vector.multi_reduction <add>, %12, %cst_6 [1] : vector<16x128xf32> to vector<16xf32>
    %14 = vector.shape_cast %13 : vector<16xf32> to vector<16x1xf32>
    %cst_7 = arith.constant 3.125000e-02 : f32
    %15 = vector.broadcast %cst_7 : f32 to vector<16x1xf32>
    %16 = arith.mulf %11, %15 : vector<16x1xf32>
    %cst_8 = arith.constant 3.125000e-02 : f32
    %17 = vector.broadcast %cst_8 : f32 to vector<16x1xf32>
    %18 = arith.mulf %14, %17 : vector<16x1xf32>
    %19 = arith.mulf %16, %16 : vector<16x1xf32>
    %20 = arith.subf %18, %19 : vector<16x1xf32>
    %cst_9 = arith.constant 9.99999974E-6 : f32
    %21 = vector.broadcast %cst_9 : f32 to vector<16x1xf32>
    %22 = arith.addf %20, %21 : vector<16x1xf32>
    %23 = math.rsqrt %22 : vector<16x1xf32>
    %24 = vector.broadcast %16 : vector<16x1xf32> to vector<16x128xf32>
    %25 = arith.subf %9, %24 : vector<16x128xf32>
    %26 = vector.broadcast %23 : vector<16x1xf32> to vector<16x128xf32>
    %27 = arith.mulf %25, %26 : vector<16x128xf32>
    %28 = vector.broadcast %5 : vector<1x128xf32> to vector<16x128xf32>
    %29 = arith.mulf %27, %28 : vector<16x128xf32>
    %30 = vector.broadcast %6 : vector<1x128xf32> to vector<16x128xf32>
    %31 = arith.addf %29, %30 : vector<16x128xf32>
    %cst_10 = arith.constant 0.000000e+00 : f32
    %32 = vector.broadcast %cst_10 : f32 to vector<16x128xf32>
    %33 = arith.maximumf %31, %32 : vector<16x128xf32>
    %34 = arith.truncf %33 : vector<16x128xf32> to vector<16x128xbf16>
    %c0_11 = arith.constant 0 : index
    %c0_12 = arith.constant 0 : index
    %35 = vector.load %arg4[%c0_11, %c0_12] : memref<128x128xbf16, #tpu.memory_space<vmem>>, vector<128x128xbf16>
    %c0_13 = arith.constant 0 : index
    %c0_14 = arith.constant 0 : index
    %36 = vector.load %arg5[%c0_13, %c0_14] : memref<3x128xf32, #tpu.memory_space<vmem>>, vector<3x128xf32>
    %37 = vector.extract_strided_slice %36 {offsets = [0, 0], sizes = [1, 128], strides = [1, 1]} : vector<3x128xf32> to vector<1x128xf32>
    %38 = vector.extract_strided_slice %36 {offsets = [1, 0], sizes = [1, 128], strides = [1, 1]} : vector<3x128xf32> to vector<1x128xf32>
    %39 = vector.extract_strided_slice %36 {offsets = [2, 0], sizes = [1, 128], strides = [1, 1]} : vector<3x128xf32> to vector<1x128xf32>
    %cst_15 = arith.constant dense<0.000000e+00> : vector<16x128xf32>
    %40 = tpu.matmul %34, %35, %cst_15 {dimension_numbers = #tpu.dot_dimension_numbers<[1], [0], [0], [1], [0, 0, 1, 1], [], []>} : vector<16x128xbf16>, vector<128x128xbf16>, vector<16x128xf32> -> vector<16x128xf32>
    %41 = vector.broadcast %37 : vector<1x128xf32> to vector<16x128xf32>
    %42 = arith.addf %40, %41 : vector<16x128xf32>
    %cst_16 = arith.constant dense<0.000000e+00> : vector<16xf32>
    %43 = vector.multi_reduction <add>, %42, %cst_16 [1] : vector<16x128xf32> to vector<16xf32>
    %44 = vector.shape_cast %43 : vector<16xf32> to vector<16x1xf32>
    %45 = arith.mulf %42, %42 : vector<16x128xf32>
    %cst_17 = arith.constant dense<0.000000e+00> : vector<16xf32>
    %46 = vector.multi_reduction <add>, %45, %cst_17 [1] : vector<16x128xf32> to vector<16xf32>
    %47 = vector.shape_cast %46 : vector<16xf32> to vector<16x1xf32>
    %cst_18 = arith.constant 3.125000e-02 : f32
    %48 = vector.broadcast %cst_18 : f32 to vector<16x1xf32>
    %49 = arith.mulf %44, %48 : vector<16x1xf32>
    %cst_19 = arith.constant 3.125000e-02 : f32
    %50 = vector.broadcast %cst_19 : f32 to vector<16x1xf32>
    %51 = arith.mulf %47, %50 : vector<16x1xf32>
    %52 = arith.mulf %49, %49 : vector<16x1xf32>
    %53 = arith.subf %51, %52 : vector<16x1xf32>
    %cst_20 = arith.constant 9.99999974E-6 : f32
    %54 = vector.broadcast %cst_20 : f32 to vector<16x1xf32>
    %55 = arith.addf %53, %54 : vector<16x1xf32>
    %56 = math.rsqrt %55 : vector<16x1xf32>
    %57 = vector.broadcast %49 : vector<16x1xf32> to vector<16x128xf32>
    %58 = arith.subf %42, %57 : vector<16x128xf32>
    %59 = vector.broadcast %56 : vector<16x1xf32> to vector<16x128xf32>
    %60 = arith.mulf %58, %59 : vector<16x128xf32>
    %61 = vector.broadcast %38 : vector<1x128xf32> to vector<16x128xf32>
    %62 = arith.mulf %60, %61 : vector<16x128xf32>
    %63 = vector.broadcast %39 : vector<1x128xf32> to vector<16x128xf32>
    %64 = arith.addf %62, %63 : vector<16x128xf32>
    %cst_21 = arith.constant 0.000000e+00 : f32
    %65 = vector.broadcast %cst_21 : f32 to vector<16x128xf32>
    %66 = arith.maximumf %64, %65 : vector<16x128xf32>
    %67 = arith.truncf %66 : vector<16x128xf32> to vector<16x128xbf16>
    %c0_22 = arith.constant 0 : index
    %c0_23 = arith.constant 0 : index
    %68 = vector.load %arg6[%c0_22, %c0_23] : memref<128x128xbf16, #tpu.memory_space<vmem>>, vector<128x128xbf16>
    %c0_24 = arith.constant 0 : index
    %c0_25 = arith.constant 0 : index
    %69 = vector.load %arg7[%c0_24, %c0_25] : memref<1x128xf32, #tpu.memory_space<vmem>>, vector<1x128xf32>
    %cst_26 = arith.constant dense<0.000000e+00> : vector<16x128xf32>
    %70 = tpu.matmul %67, %68, %cst_26 {dimension_numbers = #tpu.dot_dimension_numbers<[1], [0], [0], [1], [0, 0, 1, 1], [], []>} : vector<16x128xbf16>, vector<128x128xbf16>, vector<16x128xf32> -> vector<16x128xf32>
    %71 = vector.broadcast %69 : vector<1x128xf32> to vector<16x128xf32>
    %72 = arith.addf %70, %71 : vector<16x128xf32>
    %c0_27 = arith.constant 0 : index
    %c0_28 = arith.constant 0 : index
    %73 = vector.load %arg8[%c0_27, %c0_28] : memref<16x128xf32, #tpu.memory_space<vmem>>, vector<16x128xf32>
    tpu.vector_store %arg8[%c0_27, %c0_28], %72 {strides = array<i32>} : memref<16x128xf32, #tpu.memory_space<vmem>>, vector<16x128xf32>,
    return
  }
  func.func @transform_0(%arg0: i32) -> (i32, i32) {
    %c0_i32 = arith.constant 0 : i32
    %c0_i32_0 = arith.constant 0 : i32
    return %arg0, %c0_i32 : i32, i32
  }
  func.func @transform_1(%arg0: i32) -> (i32, i32) {
    %c0_i32 = arith.constant 0 : i32
    %c0_i32_0 = arith.constant 0 : i32
    %c0_i32_1 = arith.constant 0 : i32
    return %c0_i32, %c0_i32_0 : i32, i32
  }
  func.func @transform_2(%arg0: i32) -> (i32, i32) {
    %c0_i32 = arith.constant 0 : i32
    %c0_i32_0 = arith.constant 0 : i32
    %c0_i32_1 = arith.constant 0 : i32
    return %c0_i32, %c0_i32_0 : i32, i32
  }
  func.func @transform_3(%arg0: i32) -> (i32, i32) {
    %c0_i32 = arith.constant 0 : i32
    %c0_i32_0 = arith.constant 0 : i32
    %c0_i32_1 = arith.constant 0 : i32
    return %c0_i32, %c0_i32_0 : i32, i32
  }
  func.func @transform_4(%arg0: i32) -> (i32, i32) {
    %c0_i32 = arith.constant 0 : i32
    %c0_i32_0 = arith.constant 0 : i32
    %c0_i32_1 = arith.constant 0 : i32
    return %c0_i32, %c0_i32_0 : i32, i32
  }
  func.func @transform_5(%arg0: i32) -> (i32, i32) {
    %c0_i32 = arith.constant 0 : i32
    %c0_i32_0 = arith.constant 0 : i32
    %c0_i32_1 = arith.constant 0 : i32
    return %c0_i32, %c0_i32_0 : i32, i32
  }
  func.func @transform_6(%arg0: i32) -> (i32, i32) {
    %c0_i32 = arith.constant 0 : i32
    %c0_i32_0 = arith.constant 0 : i32
    %c0_i32_1 = arith.constant 0 : i32
    return %c0_i32, %c0_i32_0 : i32, i32
  }
  func.func @transform_7(%arg0: i32) -> (i32, i32) {
    %c0_i32 = arith.constant 0 : i32
    %c0_i32_0 = arith.constant 0 : i32
    return %arg0, %c0_i32 : i32, i32
  }
}

</mosaic_0001>

<bundles_post_ra>
// kernel: tpu_custom_call.1
= control target key start
LH: loop header
LB: loop body
LE: loop exit
PB: predicated region body
PF: predicated region fallthrough
CT: control target
= control target key end

     0   :  { %12 = vsyncpa [#allocation3], 0  ;;  %s983_s0 = inlined_call_operand.hbm [shape: f32[16,128], index: 0, kind: input, shape index: {}]   ;;  %s984_s1 = inlined_call_operand.hbm [shape: bf16[128,128], index: 1, kind: input, shape index: {}]   ;;  %s985_s2 = inlined_call_operand.vmem [shape: f32[3,128], index: 2, kind: input, shape index: {}]   ;;  %s986_s3 = inlined_call_operand.hbm [shape: bf16[128,128], index: 3, kind: input, shape index: {}]   ;;  %s987_s4 = inlined_call_operand.vmem [shape: f32[3,128], index: 4, kind: input, shape index: {}]   ;;  %s988_s5 = inlined_call_operand.hbm [shape: bf16[128,128], index: 5, kind: input, shape index: {}]   ;;  %s989_s6 = inlined_call_operand.vmem [shape: f32[1,128], index: 6, kind: input, shape index: {}]   ;;  %s990_s7 = inlined_call_operand.hbm [shape: f32[16,128], index: 7, kind: output, shape index: {}]  }
   0x1   :  { %13 = vsyncpa [#allocation6], 0 }
   0x2   :  { %14 = vsyncpa [#allocation9], 0 }
   0x3   :  { %15 = vsyncpa [#allocation4], 0  ;;  %s794_s24 = smov [#allocation5]   ;;  %s676_s28 = scalar_lea.hbm %s984_s1, 1024 }
   0x4   :  { %s33_s25 = sshll.u32 %s794_s24, 4  ;;  %p677_p0 = scmp.ne.s32.totalorder %s984_s1, %s676_s28  ;;  %s34_s25 = int_to_ptr.vmem [resolvable:$true] %s33_s25 }
   0x5   :  { %p680_p1 = scmp.lt.u32.totalorder %s676_s28, %s984_s1 }
   0x7   :  { %p682_p2 = pnand %p680_p1, %p677_p0 }
   0x9   :  { %685 = shalt.err (!%p682_p2)
}
   0xa   :  { %s686_s10 = scalar_lea.vmem %s34_s25, 1024  ;;  %p691_p4 = scmp.lt.s32.totalorder %s34_s25, %s34_s25 }
   0xb   :  { %p687_p3 = scmp.ne.s32.totalorder %s34_s25, %s686_s10  ;;  %p692_p5 = scmp.lt.s32.totalorder %s686_s10, %s686_s10 }
   0xd   :  { %p693_p6 = por %p692_p5, %p691_p4 }
   0xf   :  { %p694_p7 = pnand %p693_p6, %p687_p3 }
  0x11   :  { %697 = shalt.err (!%p694_p7)
}
  0x12   :  { %s795_s11 = smov 64   ;;  %s796_s12 = smov 4  }
  0x13   :  { %39 = dma.hbm_to_vmem [thread:$0]  %s984_s1, 1024, %s34_s25, [#allocation6], %s795_s11, %s795_s11, %s796_s12  }
  0x14   :  { %s797_s15 = smov [#allocation2]   ;;  %s698_s19 = scalar_lea.hbm %s983_s0, 256 }
  0x15   :  { %s21_s16 = sshll.u32 %s797_s15, 4  ;;  %p699_p8 = scmp.ne.s32.totalorder %s983_s0, %s698_s19  ;;  %s22_s16 = int_to_ptr.vmem [resolvable:$true] %s21_s16 }
  0x16   :  { %p702_p9 = scmp.lt.u32.totalorder %s698_s19, %s983_s0 }
  0x18   :  { %p704_p10 = pnand %p702_p9, %p699_p8 }
  0x1a   :  { %707 = shalt.err (!%p704_p10)
}
  0x1b   :  { %s708_s24 = scalar_lea.vmem %s22_s16, 256  ;;  %p713_p12 = scmp.lt.s32.totalorder %s22_s16, %s22_s16 }
  0x1c   :  { %p709_p11 = scmp.ne.s32.totalorder %s22_s16, %s708_s24  ;;  %p714_p13 = scmp.lt.s32.totalorder %s708_s24, %s708_s24 }
  0x1e   :  { %p715_p0 = por %p714_p13, %p713_p12 }
  0x20   :  { %p716_p1 = pnand %p715_p0, %p709_p11 }
  0x22   :  { %719 = shalt.err (!%p716_p1)
}
  0x23   :  { %s798_s1 = smov 128   ;;  %s799_s25 = smov 8  }
  0x24   :  { %27 = dma.hbm_to_vmem [thread:$0]  %s983_s0, 256, %s22_s16, [#allocation3], %s798_s1, %s798_s1, %s799_s25  }
  0x25   :  { %s800_s28 = smov [#allocation7]   ;;  %s801_s30 = smov [#allocation8]  }
  0x26   :  { %s47_s29 = sshll.u32 %s800_s28, 4  ;;  %s61_s8 = sshll.u32 %s801_s30, 4  ;;  %s48_s29 = int_to_ptr.vmem [resolvable:$true] %s47_s29  ;;  %s875_s8 = int_to_ptr.vmem [resolvable:$true] %s61_s8 }
  0x27   :  { %s720_s13 = scalar_lea.hbm %s986_s3, 1024 }
  0x28   :  { %p721_p2 = scmp.ne.s32.totalorder %s986_s3, %s720_s13  ;;  %p724_p3 = scmp.lt.u32.totalorder %s720_s13, %s986_s3 }
  0x2a   :  { %p726_p4 = pnand %p724_p3, %p721_p2 }
  0x2c   :  { %729 = shalt.err (!%p726_p4)
}
  0x2d   :  { %s730_s0 = scalar_lea.vmem %s48_s29, 1024  ;;  %p735_p6 = scmp.lt.s32.totalorder %s48_s29, %s48_s29 }
  0x2e   :  { %p731_p5 = scmp.ne.s32.totalorder %s48_s29, %s730_s0  ;;  %p736_p7 = scmp.lt.s32.totalorder %s730_s0, %s730_s0 }
  0x30   :  { %p737_p8 = por %p736_p7, %p735_p6 }
  0x32   :  { %p738_p9 = pnand %p737_p8, %p731_p5 }
  0x34   :  { %741 = shalt.err (!%p738_p9)
}
  0x35   :  { %53 = dma.hbm_to_vmem [thread:$0]  %s986_s3, 1024, %s48_s29, [#allocation6], %s795_s11, %s795_s11, %s796_s12  }
  0x36   :  { %s742_s22 = scalar_lea.hbm %s988_s5, 1024 }
  0x37   :  { %p743_p10 = scmp.ne.s32.totalorder %s988_s5, %s742_s22  ;;  %p746_p11 = scmp.lt.u32.totalorder %s742_s22, %s988_s5 }
  0x39   :  { %p748_p12 = pnand %p746_p11, %p743_p10 }
  0x3b   :  { %751 = shalt.err (!%p748_p12)
}
  0x3c   :  { %s752_s28 = scalar_lea.vmem %s875_s8, 1024  ;;  %p757_p0 = scmp.lt.s32.totalorder %s875_s8, %s875_s8 }
  0x3d   :  { %p753_p13 = scmp.ne.s32.totalorder %s875_s8, %s752_s28  ;;  %p758_p1 = scmp.lt.s32.totalorder %s752_s28, %s752_s28 }
  0x3f   :  { %p759_p2 = por %p758_p1, %p757_p0 }
  0x41   :  { %p760_p3 = pnand %p759_p2, %p753_p13 }
  0x43   :  { %763 = shalt.err (!%p760_p3)
}
  0x44   :  { %67 = dma.hbm_to_vmem [thread:$0]  %s988_s5, 1024, %s875_s8, [#allocation9], %s795_s11, %s795_s11, %s796_s12  }
  0x45   :  { %786 = dma.done.wait [#allocation3], 256  }
  0x46   :  { %787 = vsyncadd [#allocation3], 4294967040 }
  0x47   :  { %788 = dma.done.wait [#allocation6], 2048  }
  0x48   :  { %789 = vsyncadd [#allocation6], 4294965248 }
  0x49   :  { %790 = dma.done.wait [#allocation9], 1024  }
  0x4a   :  { %791 = vsyncadd [#allocation9], 4294966272  ;;  %v802_v0 = vmov 0.0   ;;  %vm803_vm0 = vmmov 0   ;;  %v644_v1 = vld [vmem:[#allocation5] sm:$0xff]   ;;  %v645_v2 = vld [vmem:[#allocation5 + $0x8] sm:$0xff]   ;;  %v103_v12 = vlaneseq }
  0x4b   :  { %573 = vmatprep.subr.bf16.mxu0 %v802_v0  ;;  %589 = vmatprep.mubr.msk.bf16.mxu0 %vm803_vm0, %v802_v0  ;;  %v646_v3 = vld [vmem:[#allocation5 + $0x10] sm:$0xff]   ;;  %v647_v4 = vld [vmem:[#allocation5 + $0x18] sm:$0xff]   ;;  %v648_v5 = vld [vmem:[#allocation5 + $0x20] sm:$0xff]   ;;  %s804_s8 = smov [#allocation10]  }
  0x4c   :  { %593 = vmatprep.subr.bf16.mxu1 %v802_v0  ;;  %609 = vmatprep.mubr.msk.bf16.mxu1 %vm803_vm0, %v802_v0  ;;  %v649_v6 = vld [vmem:[#allocation5 + $0x28] sm:$0xff]   ;;  %v650_v7 = vld [vmem:[#allocation5 + $0x30] sm:$0xff]   ;;  %v651_v8 = vld [vmem:[#allocation5 + $0x38] sm:$0xff]   ;;  %v928_v13 = vshrl.u32 %v103_v12, 7  ;;  %s507_s9 = sshll.u32 %s804_s8, 4  ;;  %s508_s9 = int_to_ptr.vmem [resolvable:$true] %s507_s9 }
  0x4d   :  { %574 = vmatpush3.bf16.msra.mxu0 %v644_v1  ;;  %v83_v9 = vld [vmem:[#allocation2] sm:$0xff]  ;;  %v84_v10 = vld [vmem:[#allocation2 + $0x8] sm:$0xff]  ;;  %v652_v25 = vld [vmem:[#allocation7] sm:$0xff]   ;;  %s764_s10 = scalar_lea.vmem %s508_s9, 256  ;;  %p769_p5 = scmp.lt.s32.totalorder %s508_s9, %s508_s9 }
  0x4e   :  { %575 = vmatprep.subr.bf16.mxu0 %v802_v0  ;;  %v85_v11 = vpack.c.bf16 %v84_v10, %v83_v9  ;;  %v105_v14 = vsub.s32 0, %v928_v13  ;;  %v102_v15 = vld [vmem:[%s985_s2] sm:$0x7]  ;;  %594 = vmatpush3.bf16.msra.mxu1 %v652_v25  ;;  %v653_v26 = vld [vmem:[#allocation7 + $0x8] sm:$0xff]   ;;  %v655_v28 = vld [vmem:[#allocation7 + $0x18] sm:$0xff]   ;;  %v224_v47 = vsub.s32 1, %v928_v13  ;;  %p765_p4 = scmp.ne.s32.totalorder %s508_s9, %s764_s10  ;;  %p770_p6 = scmp.lt.s32.totalorder %s764_s10, %s764_s10 }
  0x4f   :  { %595 = vmatprep.subr.bf16.mxu1 %v802_v0  ;;  %v654_v27 = vld [vmem:[#allocation7 + $0x10] sm:$0xff]   ;;  %v656_v29 = vld [vmem:[#allocation7 + $0x20] sm:$0xff]   ;;  %v657_v30 = vld [vmem:[#allocation7 + $0x28] sm:$0xff]   ;;  %v230_v49 = vsub.s32 2, %v928_v13 }
  0x50   :  { %v106_v16 = vrot.slane %v102_v15, %v105_v14  ;;  %v658_v31 = vld [vmem:[#allocation7 + $0x30] sm:$0xff]   ;;  %v659_v32 = vld [vmem:[#allocation7 + $0x38] sm:$0xff]   ;;  %v225_v48 = vrot.slane %v102_v15, %v224_v47  ;;  %v661_v12 = vld [vmem:[#allocation8 + $0x8] sm:$0xff]   ;;  %p771_p7 = por %p770_p6, %p769_p5 }
  0x51   :  { %576 = vmatpush3.bf16.msra.mxu0 %v645_v2  ;;  %v231_v53 = vrot.slane %v102_v15, %v230_v49  ;;  %v253_v1 = vld [vmem:[%s987_s4] sm:$0x7]  ;;  %v663_v15 = vld [vmem:[#allocation8 + $0x18] sm:$0xff]  }
  0x52   :  { %577 = vmatprep.subr.bf16.mxu0 %v802_v0  ;;  %596 = vmatpush3.bf16.msra.mxu1 %v653_v26  ;;  %v257_v2 = vrot.slane %v253_v1, %v105_v14  ;;  %v662_v14 = vld [vmem:[#allocation8 + $0x10] sm:$0xff]   ;;  %p772_p8 = pnand %p771_p7, %p765_p4 }
  0x53   :  { %597 = vmatprep.subr.bf16.mxu1 %v802_v0 }
  0x55   :  { %578 = vmatpush3.bf16.msra.mxu0 %v646_v3 }
  0x56   :  { %579 = vmatprep.subr.bf16.mxu0 %v802_v0  ;;  %598 = vmatpush3.bf16.msra.mxu1 %v654_v27 }
  0x57   :  { %599 = vmatprep.subr.bf16.mxu1 %v802_v0 }
  0x59   :  { %580 = vmatpush3.bf16.msra.mxu0 %v647_v4 }
  0x5a   :  { %581 = vmatprep.subr.bf16.mxu0 %v802_v0  ;;  %600 = vmatpush3.bf16.msra.mxu1 %v655_v28 }
  0x5b   :  { %601 = vmatprep.subr.bf16.mxu1 %v802_v0 }
  0x5d   :  { %582 = vmatpush3.bf16.msra.mxu0 %v648_v5 }
  0x5e   :  { %583 = vmatprep.subr.bf16.mxu0 %v802_v0  ;;  %602 = vmatpush3.bf16.msra.mxu1 %v656_v29 }
  0x5f   :  { %603 = vmatprep.subr.bf16.mxu1 %v802_v0 }
  0x61   :  { %584 = vmatpush3.bf16.msra.mxu0 %v649_v6 }
  0x62   :  { %585 = vmatprep.subr.bf16.mxu0 %v802_v0  ;;  %604 = vmatpush3.bf16.msra.mxu1 %v657_v30 }
  0x63   :  { %605 = vmatprep.subr.bf16.mxu1 %v802_v0 }
  0x65   :  { %586 = vmatpush3.bf16.msra.mxu0 %v650_v7 }
  0x66   :  { %587 = vmatprep.subr.bf16.mxu0 %v802_v0  ;;  %606 = vmatpush3.bf16.msra.mxu1 %v658_v31 }
  0x67   :  { %607 = vmatprep.subr.bf16.mxu1 %v802_v0 }
  0x69   :  { %588 = vmatpush3.bf16.msra.mxu0 %v651_v8 }
  0x6a   :  { %613 = vmatprep.subr.bf16.mxu0 %v802_v0  ;;  %608 = vmatpush3.bf16.msra.mxu1 %v659_v32 }
  0x6c   :  { %590 = vmatmul.mubr.bf16.vlgmr.msra.gmra.mrb[0].mxu0 %v85_v11  ;;  %v660_v11 = vld [vmem:[#allocation8] sm:$0xff]  }
  0x6d   :  { %629 = vmatprep.mubr.msk.bf16.mxu0 %vm803_vm0, %v802_v0  ;;  %614 = vmatpush3.bf16.msra.mxu0 %v660_v11 }
  0x6e   :  { %615 = vmatprep.subr.bf16.mxu0 %v802_v0 }
  0x71   :  { %616 = vmatpush3.bf16.msra.mxu0 %v661_v12 }
  0x72   :  { %617 = vmatprep.subr.bf16.mxu0 %v802_v0 }
  0x75   :  { %618 = vmatpush3.bf16.msra.mxu0 %v662_v14 }
  0x76   :  { %619 = vmatprep.subr.bf16.mxu0 %v802_v0 }
  0x79   :  { %620 = vmatpush3.bf16.msra.mxu0 %v663_v15 }
  0x7a   :  { %621 = vmatprep.subr.bf16.mxu0 %v802_v0 }
 0x13f   :  { %v189_v17 = vpop.f32.mrb[0].mxu0 }
 0x140   :  { %v190_v18 = vadd.f32 %v189_v17, %v106_v16  ;;  %v591_v19 = vpop.f32.mrb[1].mxu0  ;;  %v665_v17 = vld [vmem:[#allocation8 + $0x28] sm:$0xff]  }
 0x141   :  { %v192_v20 = vpop.f32.mrb[2].mxu0  ;;  %v667_v19 = vld [vmem:[#allocation8 + $0x38] sm:$0xff]  }
 0x142   :  { %v193_v21 = vadd.f32 %v192_v20, %v106_v16  ;;  %196 = vadd.xlane.f32.xlu0 %v190_v18  ;;  %v592_v22 = vpop.f32.mrb[3].mxu0  ;;  %v200_v23 = vmul.f32 %v190_v18, %v190_v18  ;;  %v664_v16 = vld [vmem:[#allocation8 + $0x20] sm:$0xff]  }
 0x143   :  { %622 = vmatpush3.bf16.msra.mxu0 %v664_v16 }
 0x144   :  { %202 = vadd.xlane.f32.xlu1 %v200_v23  ;;  %v201_v24 = vmul.f32 %v193_v21, %v193_v21  ;;  %623 = vmatprep.subr.bf16.mxu0 %v802_v0 }
 0x146   :  { %198 = vadd.xlane.f32.xlu0 %v193_v21 }
 0x147   :  { %624 = vmatpush3.bf16.msra.mxu0 %v665_v17 }
 0x148   :  { %204 = vadd.xlane.f32.xlu1 %v201_v24  ;;  %625 = vmatprep.subr.bf16.mxu0 %v802_v0 }
 0x1cf   :  { %v197_v33 = vpop.xlane.xlu0 %196 }
 0x1d0   :  { %v206_v34 = vmul.f32 0.03125, %v197_v33 }
 0x1d1   :  { %v203_v35 = vpop.xlane.xlu1 %202 }
 0x1d2   :  { %v210_v36 = vmul.f32 %v206_v34, %v206_v34  ;;  %v208_v37 = vmul.f32 0.03125, %v203_v35  ;;  %v218_v50 = vsub.f32 %v190_v18, %v206_v34  ;;  %v666_v18 = vld [vmem:[#allocation8 + $0x30] sm:$0xff]  }
 0x1d3   :  { %v199_v38 = vpop.xlane.xlu0 %198  ;;  %626 = vmatpush3.bf16.msra.mxu0 %v666_v18 }
 0x1d4   :  { %v212_v39 = vsub.f32 %v208_v37, %v210_v36  ;;  %v207_v40 = vmul.f32 0.03125, %v199_v38  ;;  %627 = vmatprep.subr.bf16.mxu0 %v802_v0  ;;  %v376_v0 = vrot.slane %v253_v1, %v224_v47  ;;  %v382_v36 = vrot.slane %v253_v1, %v230_v49  ;;  %v537_v47 = vld [vmem:[%s989_s6] ss:$0 sm:$0xff] }
 0x1d5   :  { %v205_v41 = vpop.xlane.xlu1 %204 }
 0x1d6   :  { %v214_v42 = vadd.f32 1e-05, %v212_v39  ;;  %v211_v43 = vmul.f32 %v207_v40, %v207_v40  ;;  %v209_v44 = vmul.f32 0.03125, %v205_v41  ;;  %v219_v54 = vsub.f32 %v193_v21, %v207_v40 }
 0x1d7   :  { %628 = vmatpush3.bf16.msra.mxu0 %v667_v19 }
 0x1d8   :  { %668 = vrsqrt.f32 %v214_v42  ;;  %v213_v45 = vsub.f32 %v209_v44, %v211_v43 }
 0x1da   :  { %v215_v46 = vadd.f32 1e-05, %v213_v45 }
 0x1dc   :  { %670 = vrsqrt.f32 %v215_v46 }
 0x1e2   :  { %v669_v51 = vpop.eup %668 }
 0x1e3   :  { %v220_v52 = vmul.f32 %v669_v51, %v218_v50 }
 0x1e5   :  { %v226_v55 = vmul.f32 %v225_v48, %v220_v52 }
 0x1e6   :  { %v671_v56 = vpop.eup %670 }
 0x1e7   :  { %v221_v57 = vmul.f32 %v671_v56, %v219_v54  ;;  %v232_v59 = vadd.f32 %v231_v53, %v226_v55 }
 0x1e9   :  { %v227_v58 = vmul.f32 %v225_v48, %v221_v57  ;;  %v234_v61 = vmax.f32 %v232_v59, 0.0 }
 0x1eb   :  { %v233_v60 = vadd.f32 %v231_v53, %v227_v58 }
 0x1ed   :  { %v235_v62 = vmax.f32 %v233_v60, 0.0 }
 0x1ef   :  { %v236_v63 = vpack.c.bf16 %v235_v62, %v234_v61 }
 0x1f1   :  { %610 = vmatmul.mubr.bf16.vlgmr.msra.gmra.mrb[0].mxu1 %v236_v63 }
 0x2c4   :  { %v340_v3 = vpop.f32.mrb[0].mxu1 }
 0x2c5   :  { %v341_v4 = vadd.f32 %v340_v3, %v257_v2  ;;  %v611_v5 = vpop.f32.mrb[1].mxu1 }
 0x2c6   :  { %v343_v6 = vpop.f32.mrb[2].mxu1 }
 0x2c7   :  { %v344_v7 = vadd.f32 %v343_v6, %v257_v2  ;;  %347 = vadd.xlane.f32.xlu0 %v341_v4  ;;  %v612_v8 = vpop.f32.mrb[3].mxu1  ;;  %v351_v9 = vmul.f32 %v341_v4, %v341_v4 }
 0x2c9   :  { %349 = vadd.xlane.f32.xlu1 %v344_v7  ;;  %v352_v10 = vmul.f32 %v344_v7, %v344_v7 }
 0x2cb   :  { %353 = vadd.xlane.f32.xlu0 %v351_v9 }
 0x2cd   :  { %355 = vadd.xlane.f32.xlu1 %v352_v10 }
 0x354   :  { %v348_v20 = vpop.xlane.xlu0 %347 }
 0x355   :  { %v357_v21 = vmul.f32 0.03125, %v348_v20 }
 0x356   :  { %v350_v22 = vpop.xlane.xlu1 %349 }
 0x357   :  { %v358_v23 = vmul.f32 0.03125, %v350_v22  ;;  %v361_v25 = vmul.f32 %v357_v21, %v357_v21  ;;  %v369_v34 = vsub.f32 %v341_v4, %v357_v21 }
 0x358   :  { %v354_v24 = vpop.xlane.xlu0 %353 }
 0x359   :  { %v359_v26 = vmul.f32 0.03125, %v354_v24  ;;  %v362_v28 = vmul.f32 %v358_v23, %v358_v23  ;;  %v370_v37 = vsub.f32 %v344_v7, %v358_v23 }
 0x35a   :  { %v356_v27 = vpop.xlane.xlu1 %355 }
 0x35b   :  { %v363_v29 = vsub.f32 %v359_v26, %v361_v25  ;;  %v360_v30 = vmul.f32 0.03125, %v356_v27 }
 0x35d   :  { %v365_v31 = vadd.f32 1e-05, %v363_v29  ;;  %v364_v32 = vsub.f32 %v360_v30, %v362_v28 }
 0x35f   :  { %672 = vrsqrt.f32 %v365_v31  ;;  %v366_v33 = vadd.f32 1e-05, %v364_v32 }
 0x361   :  { %674 = vrsqrt.f32 %v366_v33 }
 0x369   :  { %v673_v35 = vpop.eup %672 }
 0x36a   :  { %v371_v38 = vmul.f32 %v673_v35, %v369_v34 }
 0x36b   :  { %v675_v39 = vpop.eup %674 }
 0x36c   :  { %v372_v40 = vmul.f32 %v675_v39, %v370_v37  ;;  %v377_v41 = vmul.f32 %v376_v0, %v371_v38 }
 0x36e   :  { %v378_v42 = vmul.f32 %v376_v0, %v372_v40  ;;  %v383_v43 = vadd.f32 %v382_v36, %v377_v41 }
 0x370   :  { %v384_v44 = vadd.f32 %v382_v36, %v378_v42  ;;  %v385_v45 = vmax.f32 %v383_v43, 0.0 }
 0x372   :  { %v386_v46 = vmax.f32 %v384_v44, 0.0 }
 0x374   :  { %v387_v48 = vpack.c.bf16 %v386_v46, %v385_v45 }
 0x376   :  { %630 = vmatmul.mubr.bf16.vlgmr.msra.gmra.mrb[4].mxu0 %v387_v48 }
 0x449   :  { %v493_v50 = vpop.f32.mrb[4].mxu0 }
 0x44a   :  { %v494_v13 = vadd.f32 %v537_v47, %v493_v50  ;;  %v631_v49 = vpop.f32.mrb[5].mxu0 }
 0x44b   :  { %v496_v51 = vpop.f32.mrb[6].mxu0 }
 0x44c   :  { %500 = vst [vmem:[#allocation10] sm:$0xff] %v494_v13  ;;  %v497_v52 = vadd.f32 %v537_v47, %v496_v51  ;;  %v632_v53 = vpop.f32.mrb[7].mxu0 }
 0x44e   :  { %501 = vst [vmem:[#allocation10 + $0x8] sm:$0xff] %v497_v52 }
 0x44f   :  { %775 = shalt.err (!%p772_p8)
}
 0x450   :  { %s776_s14 = scalar_lea.hbm %s990_s7, 256 }
 0x451   :  { %p777_p9 = scmp.ne.s32.totalorder %s990_s7, %s776_s14  ;;  %p780_p10 = scmp.lt.u32.totalorder %s776_s14, %s990_s7 }
 0x453   :  { %p782_p11 = pnand %p780_p10, %p777_p9 }
 0x455   :  { %785 = shalt.err (!%p782_p11)
}
 0x456   :  { %513 = dma.vmem_to_hbm [thread:$0]  %s508_s9, 256, %s990_s7, [#allocation4], %s798_s1, %s798_s1, %s799_s25  }
 0x457   :  { %792 = dma.done.wait [#allocation4], 256  }
 0x458   :  { %793 = vsyncadd [#allocation4], 4294967040 }
 0x459   :  { %517 = vsyncpa [#allocation3], 1 }
 0x45a   :  { %518 = vsyncpa [#allocation6], 1 }
 0x45b   :  { %519 = vsyncpa [#allocation9], 1 }
 0x45c   :  { %520 = vsyncpa [#allocation4], 1 }

</bundles_post_ra>
